<compile_context>
chip_gen: v5e
topology: v5e:2x2
jax: 0.10.0
libtpu: 0.0.40
codegen_flags: <defaults>
</compile_context>

<pallas_src>
import functools

import jax
import jax.numpy as jnp
from jax.experimental import pallas as pl
from jax.experimental.pallas import tpu as pltpu

BN_EPS = 1e-5
_VMEM_LIMIT_BYTES = 48 * 1024 * 1024  # > v5e/v6e scoped defaults, < v7x 64 MiB


def _round_up(n, m):
    return ((n + m - 1) // m) * m


def _prefers_bf16_mxu():
    """bf16 MXU operands on v6e/v7x; keep f32 on v5e and earlier."""
    try:
        kind = jax.devices()[0].device_kind.lower()
    except Exception:
        return True
    return not any(tag in kind for tag in ("v2", "v3", "v4", "v5"))


# --------------------------------------------------------------------------
# Kernel: feature-major fused MLP on one (features, TB) batch tile.  The
# MinMax scaler was applied in the wrapper and both eval-mode BatchNorms are
# folded into the weights, so the body is 3 x (matmul+bias) + 2 x ReLU +
# sigmoid.
# --------------------------------------------------------------------------
def loan_pipeline_kernel(x_ref, w1_ref, b1_ref, w2_ref, b2_ref, w3_ref, b3_ref,
                         o_ref):
    mxu_dtype = w2_ref.dtype  # bf16 on v6e/v7x, f32 on v5e

    h = jnp.dot(w1_ref[...], x_ref[...],
                preferred_element_type=jnp.float32) + b1_ref[...]
    h = jnp.maximum(h, 0.0).astype(mxu_dtype)

    h = jnp.dot(w2_ref[...], h,
                preferred_element_type=jnp.float32) + b2_ref[...]
    h = jnp.maximum(h, 0.0).astype(mxu_dtype)

    # Dropout(p=0.25) is identity in eval mode.
    z = jnp.dot(w3_ref[...], h,
                preferred_element_type=jnp.float32) + b3_ref[...]
    o_ref[...] = jax.nn.sigmoid(z)


# --------------------------------------------------------------------------
# Parameter construction (torch layout: W is (out, in), b is (out,)).
# --------------------------------------------------------------------------
def make_params(key, input_dim, hidden, output_dim):
    ks = jax.random.split(key, 14)

    def lin(kw, kb, fan_out, fan_in):
        bound = 1.0 / jnp.sqrt(jnp.float32(fan_in))
        w = jax.random.uniform(kw, (fan_out, fan_in), jnp.float32, -bound, bound)
        b = jax.random.uniform(kb, (fan_out,), jnp.float32, -bound, bound)
        return w, b

    w1, b1 = lin(ks[0], ks[1], hidden, input_dim)
    w2, b2 = lin(ks[2], ks[3], hidden, hidden)
    w3, b3 = lin(ks[4], ks[5], output_dim, hidden)

    # Non-trivial BatchNorm params / running stats so the folding is exercised.
    g1 = jax.random.uniform(ks[6], (hidden,), jnp.float32, 0.5, 1.5)
    be1 = jax.random.uniform(ks[7], (hidden,), jnp.float32, -0.5, 0.5)
    rm1 = jax.random.uniform(ks[8], (hidden,), jnp.float32, -0.5, 0.5)
    rv1 = jax.random.uniform(ks[9], (hidden,), jnp.float32, 0.5, 1.5)
    g2 = jax.random.uniform(ks[10], (hidden,), jnp.float32, 0.5, 1.5)
    be2 = jax.random.uniform(ks[11], (hidden,), jnp.float32, -0.5, 0.5)
    rm2 = jax.random.uniform(ks[12], (hidden,), jnp.float32, -0.5, 0.5)
    rv2 = jax.random.uniform(ks[13], (hidden,), jnp.float32, 0.5, 1.5)

    return (w1, b1, g1, be1, rm1, rv1,
            w2, b2, g2, be2, rm2, rv2,
            w3, b3)


# --------------------------------------------------------------------------
# Constant-fold eval-mode BN1 -> hidden layer, BN2 -> out layer.  The MinMax
# scaler is NOT folded (applied in the wrapper so x enters in [0,1] -> safe
# for bf16 MXU operands).
# --------------------------------------------------------------------------
def fold_params(params, eps=BN_EPS, mxu_dtype=jnp.float32):
    (w1, b1, g1, be1, rm1, rv1,
     w2, b2, g2, be2, rm2, rv2,
     w3, b3) = params

    # BN1 (eval): s1*r + t1 folded into hidden layer.
    s1 = g1 * jax.lax.rsqrt(rv1 + eps)
    t1 = be1 - s1 * rm1
    w2f = w2 * s1[None, :]
    b2f = b2 + w2 @ t1

    # BN2 (eval): s2*r + t2 folded into out layer.
    s2 = g2 * jax.lax.rsqrt(rv2 + eps)
    t2 = be2 - s2 * rm2
    w3f = w3 * s2[None, :]
    b3f = b3 + w3 @ t2

    # MXU operands in mxu_dtype; biases stay f32 as (out, 1) broadcast columns.
    return (w1.astype(mxu_dtype), b1.reshape(-1, 1),
            w2f.astype(mxu_dtype), b2f.reshape(-1, 1),
            w3f.astype(mxu_dtype), b3f.reshape(-1, 1))


# --------------------------------------------------------------------------
# Wrapper: batch-tiled, feature-major pallas_call.  Jitted so the scale +
# transpose + pad + downcast of x fuses into a single copy feeding the kernel.
# --------------------------------------------------------------------------
@functools.partial(jax.jit, static_argnames=("tb", "use_bf16"))
def loan_pipeline(x, mins, maxs, params, *, tb=16384, use_bf16=True):
    B, in_dim = x.shape
    mxu_dtype = jnp.bfloat16 if use_bf16 else jnp.float32

    w1f, b1f, w2f, b2f, w3f, b3f = fold_params(params, mxu_dtype=mxu_dtype)
    hidden = w1f.shape[0]
    out_dim = w3f.shape[0]

    # Batch tile: multiple of 128, no larger than the padded batch; split into
    # >= 2 tiles when there is enough work so ("parallel",) can give both v7x
    # TensorCores something to do.
    bp = _round_up(B, 128)
    tb_eff = min(tb, bp)
    if bp // tb_eff < 2 and bp >= 256:
        tb_eff = _round_up(pl.cdiv(bp, 2), 128)
    n_tiles = pl.cdiv(bp, tb_eff)
    bp = n_tiles * tb_eff

    # MinMax scale -> feature-major transpose -> pad -> (optional) bf16 cast.
    # Under jit these fuse into one HBM pass over x.
    xs = (x.astype(jnp.float32) - mins) / (maxs - mins)
    x_fm = jnp.pad(xs.T, ((0, 0), (0, bp - B))).astype(mxu_dtype)

    resident = lambda i: (0, 0)  # same block every step -> stays VMEM-resident

    out_fm = pl.pallas_call(
        loan_pipeline_kernel,
        out_shape=jax.ShapeDtypeStruct((out_dim, bp), jnp.float32),
        grid=(n_tiles,),
        in_specs=[
            pl.BlockSpec((in_dim, tb_eff), lambda i: (0, i)),   # x tile
            pl.BlockSpec((hidden, in_dim), resident),           # W1
            pl.BlockSpec((hidden, 1), resident),                # b1
            pl.BlockSpec((hidden, hidden), resident),           # W2 (BN1 folded)
            pl.BlockSpec((hidden, 1), resident),                # b2
            pl.BlockSpec((out_dim, hidden), resident),          # W3 (BN2 folded)
            pl.BlockSpec((out_dim, 1), resident),               # b3
        ],
        out_specs=pl.BlockSpec((out_dim, tb_eff), lambda i: (0, i)),
        compiler_params=pltpu.CompilerParams(
            dimension_semantics=("parallel",),
            vmem_limit_bytes=_VMEM_LIMIT_BYTES),
    )(x_fm, w1f, b1f, w2f, b2f, w3f, b3f)

    # TODO(synk): if the consumer can accept (out_dim, B), drop this transpose.
    return out_fm[:, :B].T  # back to (B, out_dim)


# --------------------------------------------------------------------------
# Pure-JAX reference (original, un-folded formulation) for validation.
# --------------------------------------------------------------------------
def reference(x, mins, maxs, params, eps=BN_EPS):
    (w1, b1, g1, be1, rm1, rv1,
     w2, b2, g2, be2, rm2, rv2,
     w3, b3) = params
    xs = (x - mins) / (maxs - mins)
    h = jnp.maximum(xs @ w1.T + b1, 0.0)
    h = g1 * (h - rm1) * jax.lax.rsqrt(rv1 + eps) + be1
    h = jnp.maximum(h @ w2.T + b2, 0.0)
    h = g2 * (h - rm2) * jax.lax.rsqrt(rv2 + eps) + be2
    z = h @ w3.T + b3
    return jax.nn.sigmoid(z)


if __name__ == "__main__":
    key = jax.random.PRNGKey(0)
    k_x, k_p = jax.random.split(key)

    B, INPUT_DIM, HIDDEN, OUTPUT_DIM = 300, 4, 20, 2

    mins = jnp.array([200000., 300000., 2., 300.], dtype=jnp.float32)
    maxs = jnp.array([9900000., 39500000., 20., 900.], dtype=jnp.float32)

    # Inputs within the scaler's (mins, maxs) ranges.
    u = jax.random.uniform(k_x, (B, INPUT_DIM), jnp.float32)
    x = mins + u * (maxs - mins)

    params = make_params(k_p, INPUT_DIM, HIDDEN, OUTPUT_DIM)

    use_bf16 = _prefers_bf16_mxu()
    out = loan_pipeline(x, mins, maxs, params, use_bf16=use_bf16)
    jax.block_until_ready(out)

    ref = reference(x, mins, maxs, params)

    atol = 2e-2 if use_bf16 else 5e-3
    assert out.shape == (B, OUTPUT_DIM)
    assert bool(jnp.all(jnp.isfinite(out)))
    assert bool(jnp.all((out >= 0.0) & (out <= 1.0)))
    assert bool(jnp.allclose(out, ref, atol=atol)), \
        f"max abs diff {float(jnp.max(jnp.abs(out - ref)))}"
    print("KERNEL_OK")
</pallas_src>

<mosaic_0001>
module attributes {stable_mosaic.version = 11 : i64} {
  func.func @loan_pipeline_kernel(%arg0: i32, %arg1: memref<4x256xbf16, #tpu.memory_space<vmem>>, %arg2: memref<20x4xbf16, #tpu.memory_space<vmem>>, %arg3: memref<20x1xf32, #tpu.memory_space<vmem>>, %arg4: memref<20x20xbf16, #tpu.memory_space<vmem>>, %arg5: memref<20x1xf32, #tpu.memory_space<vmem>>, %arg6: memref<2x20xbf16, #tpu.memory_space<vmem>>, %arg7: memref<2x1xf32, #tpu.memory_space<vmem>>, %arg8: memref<2x256xf32, #tpu.memory_space<vmem>>) attributes {dimension_semantics = [#tpu.dimension_semantics<parallel>], iteration_bounds = array<i64: 2>, scalar_prefetch = 0 : i64, scratch_operands = 0 : i64, tpu.core_type = #tpu.core_type<tc>, window_params = [{transform_indices = @transform_0, window_bounds = array<i64: 4, 256>}, {pipeline_mode = #tpu.pipeline_mode<synchronous>, transform_indices = @transform_1, window_bounds = array<i64: 20, 4>}, {pipeline_mode = #tpu.pipeline_mode<synchronous>, transform_indices = @transform_2, window_bounds = array<i64: 20, 1>}, {pipeline_mode = #tpu.pipeline_mode<synchronous>, transform_indices = @transform_3, window_bounds = array<i64: 20, 20>}, {pipeline_mode = #tpu.pipeline_mode<synchronous>, transform_indices = @transform_4, window_bounds = array<i64: 20, 1>}, {pipeline_mode = #tpu.pipeline_mode<synchronous>, transform_indices = @transform_5, window_bounds = array<i64: 2, 20>}, {pipeline_mode = #tpu.pipeline_mode<synchronous>, transform_indices = @transform_6, window_bounds = array<i64: 2, 1>}, {transform_indices = @transform_7, window_bounds = array<i64: 2, 256>}]} {
    %c0 = arith.constant 0 : index
    %c0_0 = arith.constant 0 : index
    %0 = vector.load %arg2[%c0, %c0_0] : memref<20x4xbf16, #tpu.memory_space<vmem>>, vector<20x4xbf16>
    %c0_1 = arith.constant 0 : index
    %c0_2 = arith.constant 0 : index
    %1 = vector.load %arg1[%c0_1, %c0_2] : memref<4x256xbf16, #tpu.memory_space<vmem>>, vector<4x256xbf16>
    %cst = arith.constant dense<0.000000e+00> : vector<20x256xf32>
    %2 = tpu.matmul %0, %1, %cst {dimension_numbers = #tpu.dot_dimension_numbers<[1], [0], [0], [1], [0, 0, 1, 1], [], []>} : vector<20x4xbf16>, vector<4x256xbf16>, vector<20x256xf32> -> vector<20x256xf32>
    %c0_3 = arith.constant 0 : index
    %c0_4 = arith.constant 0 : index
    %3 = vector.load %arg3[%c0_3, %c0_4] : memref<20x1xf32, #tpu.memory_space<vmem>>, vector<20x1xf32>
    %4 = vector.broadcast %3 : vector<20x1xf32> to vector<20x256xf32>
    %5 = arith.addf %2, %4 : vector<20x256xf32>
    %cst_5 = arith.constant 0.000000e+00 : f32
    %6 = vector.broadcast %cst_5 : f32 to vector<20x256xf32>
    %7 = arith.maximumf %5, %6 : vector<20x256xf32>
    %8 = arith.truncf %7 : vector<20x256xf32> to vector<20x256xbf16>
    %c0_6 = arith.constant 0 : index
    %c0_7 = arith.constant 0 : index
    %9 = vector.load %arg4[%c0_6, %c0_7] : memref<20x20xbf16, #tpu.memory_space<vmem>>, vector<20x20xbf16>
    %cst_8 = arith.constant dense<0.000000e+00> : vector<20x256xf32>
    %10 = tpu.matmul %9, %8, %cst_8 {dimension_numbers = #tpu.dot_dimension_numbers<[1], [0], [0], [1], [0, 0, 1, 1], [], []>} : vector<20x20xbf16>, vector<20x256xbf16>, vector<20x256xf32> -> vector<20x256xf32>
    %c0_9 = arith.constant 0 : index
    %c0_10 = arith.constant 0 : index
    %11 = vector.load %arg5[%c0_9, %c0_10] : memref<20x1xf32, #tpu.memory_space<vmem>>, vector<20x1xf32>
    %12 = vector.broadcast %11 : vector<20x1xf32> to vector<20x256xf32>
    %13 = arith.addf %10, %12 : vector<20x256xf32>
    %cst_11 = arith.constant 0.000000e+00 : f32
    %14 = vector.broadcast %cst_11 : f32 to vector<20x256xf32>
    %15 = arith.maximumf %13, %14 : vector<20x256xf32>
    %16 = arith.truncf %15 : vector<20x256xf32> to vector<20x256xbf16>
    %c0_12 = arith.constant 0 : index
    %c0_13 = arith.constant 0 : index
    %17 = vector.load %arg6[%c0_12, %c0_13] : memref<2x20xbf16, #tpu.memory_space<vmem>>, vector<2x20xbf16>
    %cst_14 = arith.constant dense<0.000000e+00> : vector<2x256xf32>
    %18 = tpu.matmul %17, %16, %cst_14 {dimension_numbers = #tpu.dot_dimension_numbers<[1], [0], [0], [1], [0, 0, 1, 1], [], []>} : vector<2x20xbf16>, vector<20x256xbf16>, vector<2x256xf32> -> vector<2x256xf32>
    %c0_15 = arith.constant 0 : index
    %c0_16 = arith.constant 0 : index
    %19 = vector.load %arg7[%c0_15, %c0_16] : memref<2x1xf32, #tpu.memory_space<vmem>>, vector<2x1xf32>
    %20 = vector.broadcast %19 : vector<2x1xf32> to vector<2x256xf32>
    %21 = arith.addf %18, %20 : vector<2x256xf32>
    %22 = arith.negf %21 : vector<2x256xf32>
    %23 = math.exp %22 : vector<2x256xf32>
    %cst_17 = arith.constant 1.000000e+00 : f32
    %24 = vector.broadcast %cst_17 : f32 to vector<2x256xf32>
    %25 = arith.addf %24, %23 : vector<2x256xf32>
    %26 = arith.divf %24, %25 : vector<2x256xf32>
    %c0_18 = arith.constant 0 : index
    %c0_19 = arith.constant 0 : index
    %27 = vector.load %arg8[%c0_18, %c0_19] : memref<2x256xf32, #tpu.memory_space<vmem>>, vector<2x256xf32>
    tpu.vector_store %arg8[%c0_18, %c0_19], %26 {strides = array<i32>} : memref<2x256xf32, #tpu.memory_space<vmem>>, vector<2x256xf32>,
    return
  }
  func.func @transform_0(%arg0: i32) -> (i32, i32) {
    %c0_i32 = arith.constant 0 : i32
    %c0_i32_0 = arith.constant 0 : i32
    return %c0_i32, %arg0 : i32, i32
  }
  func.func @transform_1(%arg0: i32) -> (i32, i32) {
    %c0_i32 = arith.constant 0 : i32
    %c0_i32_0 = arith.constant 0 : i32
    %c0_i32_1 = arith.constant 0 : i32
    return %c0_i32, %c0_i32_0 : i32, i32
  }
  func.func @transform_2(%arg0: i32) -> (i32, i32) {
    %c0_i32 = arith.constant 0 : i32
    %c0_i32_0 = arith.constant 0 : i32
    %c0_i32_1 = arith.constant 0 : i32
    return %c0_i32, %c0_i32_0 : i32, i32
  }
  func.func @transform_3(%arg0: i32) -> (i32, i32) {
    %c0_i32 = arith.constant 0 : i32
    %c0_i32_0 = arith.constant 0 : i32
    %c0_i32_1 = arith.constant 0 : i32
    return %c0_i32, %c0_i32_0 : i32, i32
  }
  func.func @transform_4(%arg0: i32) -> (i32, i32) {
    %c0_i32 = arith.constant 0 : i32
    %c0_i32_0 = arith.constant 0 : i32
    %c0_i32_1 = arith.constant 0 : i32
    return %c0_i32, %c0_i32_0 : i32, i32
  }
  func.func @transform_5(%arg0: i32) -> (i32, i32) {
    %c0_i32 = arith.constant 0 : i32
    %c0_i32_0 = arith.constant 0 : i32
    %c0_i32_1 = arith.constant 0 : i32
    return %c0_i32, %c0_i32_0 : i32, i32
  }
  func.func @transform_6(%arg0: i32) -> (i32, i32) {
    %c0_i32 = arith.constant 0 : i32
    %c0_i32_0 = arith.constant 0 : i32
    %c0_i32_1 = arith.constant 0 : i32
    return %c0_i32, %c0_i32_0 : i32, i32
  }
  func.func @transform_7(%arg0: i32) -> (i32, i32) {
    %c0_i32 = arith.constant 0 : i32
    %c0_i32_0 = arith.constant 0 : i32
    return %c0_i32, %arg0 : i32, i32
  }
}

</mosaic_0001>

<bundles_post_ra>
// kernel: sub.13
= control target key start
LH: loop header
LB: loop body
LE: loop exit
PB: predicated region body
PF: predicated region fallthrough
CT: control target
= control target key end

     0   :  { %3 = vsyncpa [#allocation1], 0  ;;  %s50_s11 = smov [#allocation0]   ;;  %s75_s0 = inlined_call_operand.hbm [shape: f32[4], index: 0, kind: input, shape index: {}]   ;;  %s76_s1 = inlined_call_operand.vmem [shape: f32[4], index: 1, kind: input, shape index: {}]   ;;  %s77_s2 = inlined_call_operand.vmem [shape: f32[4], index: 2, kind: output, shape index: {}]  }
   0x1   :  { %s7_s0 = sshll.u32 %s75_s0, 4  ;;  %s9_s12 = sshll.u32 %s50_s11, 4  ;;  %s8_s0 = int_to_ptr.hbm [resolvable:$true] %s7_s0  ;;  %s10_s12 = int_to_ptr.vmem [resolvable:$true] %s9_s12 }
   0x2   :  { %12 = dma.hbm_to_vmem [thread:$0]  %s8_s0, 16, %s10_s12, [#allocation1]  }
   0x3   :  { %48 = dma.done.wait [#allocation1], 16  }
   0x4   :  { %49 = vsyncadd [#allocation1], 4294967280  ;;  %v15_v0 = vld [vmem:[#allocation0] sm:$0x1] }
   0x5   :  { %v16_v1 = vld [vmem:[%s76_s1] sm:$0x1] }
   0x6   :  { %v19_v2 = vsub.f32 %v15_v0, %v16_v1 }
   0x8   :  { %21 = vst [vmem:[%s77_s2] sm:$0x1] %v19_v2 }
   0x9   :  { %22 = vsyncpa [#allocation1], 1 }

// kernel: loan_pipeline.1
= control target key start
LH: loop header
LB: loop body
LE: loop exit
PB: predicated region body
PF: predicated region fallthrough
CT: control target
= control target key end

     0   :  { %s707_s24 = smov 0   ;;  %s780_s0 = inlined_call_operand.vmem [shape: bf16[4,512], index: 0, kind: input, shape index: {}]   ;;  %s781_s1 = inlined_call_operand.vmem [shape: bf16[20,4], index: 1, kind: input, shape index: {}]   ;;  %s782_s2 = inlined_call_operand.vmem [shape: f32[20,1], index: 2, kind: input, shape index: {}]   ;;  %s783_s3 = inlined_call_operand.vmem [shape: bf16[20,20], index: 3, kind: input, shape index: {}]   ;;  %s784_s4 = inlined_call_operand.vmem [shape: f32[20,1], index: 4, kind: input, shape index: {}]   ;;  %s785_s5 = inlined_call_operand.vmem [shape: bf16[2,20], index: 5, kind: input, shape index: {}]   ;;  %s786_s6 = inlined_call_operand.vmem [shape: f32[2,1], index: 6, kind: input, shape index: {}]   ;;  %s787_s7 = inlined_call_operand.vmem [shape: f32[2,512], index: 7, kind: output, shape index: {}]  }
   0x1 LB: > { %s605_s25 = sadd.s32 4294967295, %s664_s24   ;;  %p609_p0 = scmp.ge.s32.totalorder %s664_s24, 1  ;;  %s664_s24 = sphi %s707_s24, %s17_s24  }
   0x2   : > { %p238_p1 = scmp.lt.s32.totalorder %s664_s24, 3 }
   0x4   : > { %p239_p2 = pnand %p609_p0, %p238_p1 }
   0x5   : > { %s610_s26 = sshll.u32 (!%p239_p2), %s605_s25, 1 }
   0x6   : > { %242 = sbr.rel (%p239_p2) target bundleno = 506 (0x1fa), region = 48  ;;  %p271_p3 = scmp.lt.s32.totalorder (!%p239_p2), %s610_s26, 3 }
   0xb   : > { %v666_v0 = vmov 0   ;;  %v289_v1 = vld [vmem:[%s782_s2 + $0x10] sm:$0xf]  ;;  %s789_s26 = smov (!%p271_p3, %s610_s26), 3  ;;  %v288_v2 = vld [vmem:[%s782_s2 + $0x8] sm:$0xff]  ;;  %v287_v4 = vld [vmem:[%s782_s2] sm:$0xff] }
   0xc   : > { %647 = vset.pattern.permute.xlu0 %v666_v0  ;;  %648 = vset.pattern.permute.xlu1 %v666_v0  ;;  %s611_s8 = sshll.u32 %s789_s26, 1  ;;  %v380_v5 = vld [vmem:[%s784_s4 + $0x10] sm:$0xf]  ;;  %vm324_vm0 = vcmask 1041408   ;;  %v464_v6 = vld [vmem:[%s786_s6] sm:$0x3] }
   0xd   : > { %302 = vperm.xlu0 %647, %v289_v1   ;;  %649 = vset.pattern.permute.xlu2 %v666_v0  ;;  %s274_s11 = scalar_lea.vmem %s780_s0, %s611_s8  ;;  %v636_v11 = vld [vmem:[%s781_s1] sm:$0xff]  ;;  %vm317_vm1 = vcmask 31744   ;;  %v285_v12 = vld [vmem:[%s781_s1 + $0x8] sm:$0x3]  ;;  %vm404_vm2 = vcmask 162816   ;;  %s280_s14 = scalar_lea.vmem %s787_s7, %s611_s8 }
   0xe   : > { %297 = vperm.xlu1 %648, %v288_v2   ;;  %v286_v3 = vld [vmem:[%s274_s11] sm:$0xf]  ;;  %v310_v13 = vunpack.c.l.b16 %v285_v12  ;;  %v379_v37 = vld [vmem:[%s784_s4 + $0x8] sm:$0xff] }
   0xf   : > { %314 = vst [vmem:[#allocation1] ss:$4 sm:$0xff] %v286_v3  ;;  %v378_v21 = vld [vmem:[%s784_s4] sm:$0xff]  ;;  %v377_v47 = vld [vmem:[%s783_s3 + $0x8] sm:$0x3] }
  0x10   : > { %v312_v14 = vpack.c.b16 %v310_v13, %v310_v13  ;;  %383 = vperm.xlu2 %649, %v378_v21   ;;  %v637_v46 = vld [vmem:[%s783_s3] sm:$0xff]  ;;  %v401_v48 = vunpack.c.l.b16 %v377_v47 }
  0x12   : > { %v403_v49 = vpack.c.b16 %v401_v48, %v401_v48 }
  0x15   : > { %292 = vperm.xlu0 %647, %v287_v4  }
  0x16   : > { %393 = vperm.xlu1 %648, %v380_v5   ;;  %v315_v7 = vld.sshfl [vmem:[#allocation1] sm:$0xff pattern:$0x73625140]  ;;  %v316_v8 = vld.sshfl [vmem:[#allocation1 + $0x8] sm:$0xff pattern:$0x73625140] }
  0x17   : > { %v325_v9 = vsel %vm324_vm0, %v315_v7, 0  ;;  %v327_v10 = vsel %vm324_vm0, %v316_v8, 0 }
  0x18   : > { %336 = vmatpush.bf16.msra.mxu0 %v325_v9  ;;  %354 = vmatpush.bf16.msra.mxu1 %v327_v10 }
  0x19   : > { %388 = vperm.xlu2 %649, %v379_v37  }
  0x1b   : > { %618 = vmatmul.msk.bf16.vlgmr.msra.gmra.mxu0 %vm317_vm1, %v636_v11  ;;  %620 = vmatmul.msk.bf16.vlgmr.msra.gmra.mxu1 %vm317_vm1, %v636_v11 }
  0x1d   : > { %467 = vperm.xlu0 %647, %v464_v6  }
  0x2b   : > { %619 = vmatmul.msk.bf16.gmra.mxu0 %vm317_vm1, %v312_v14  ;;  %621 = vmatmul.msk.bf16.gmra.mxu1 %vm317_vm1, %v312_v14 }
  0x6a   : > { %v384_v52 = vpop.permute.xlu2 %383 }
  0x73   : > { %v389_v56 = vpop.permute.xlu2 %388 }
  0x7f   : > { %v303_v17 = vpop.permute.xlu0 %302 }
  0x80   : > { %v298_v20 = vpop.permute.xlu1 %297 }
  0x87   : > { %v293_v24 = vpop.permute.xlu0 %292 }
  0x88   : > { %v394_v55 = vpop.permute.xlu1 %393 }
  0x98   : > { %v338_v15 = vpop.f32.mrf.mxu0  ;;  %v356_v16 = vpop.f32.mrf.mxu1 }
  0x99   : > { %v339_v31 = vadd.f32 %v338_v15, %v293_v24  ;;  %v357_v32 = vadd.f32 %v356_v16, %v293_v24  ;;  %v463_v15 = vld [vmem:[%s785_s5] sm:$0x1]  ;;  %v468_v16 = vpop.permute.xlu0 %467 }
  0x9b   : > { %v365_v40 = vmax.f32 %v339_v31, 0.0  ;;  %v366_v41 = vmax.f32 %v357_v32, 0.0 }
  0xa0   : > { %v340_v18 = vpop.f32.mrf.mxu0  ;;  %v358_v19 = vpop.f32.mrf.mxu1 }
  0xa1   : > { %v341_v27 = vadd.f32 %v340_v18, %v298_v20  ;;  %v359_v28 = vadd.f32 %v358_v19, %v298_v20 }
  0xa3   : > { %v367_v35 = vmax.f32 %v341_v27, 0.0  ;;  %v368_v36 = vmax.f32 %v359_v28, 0.0 }
  0xa5   : > { %v371_v44 = vpack.c.bf16 %v367_v35, %v365_v40  ;;  %v372_v45 = vpack.c.bf16 %v368_v36, %v366_v41 }
  0xa8   : > { %v343_v22 = vpop.f32.mrf.mxu0  ;;  %v361_v23 = vpop.f32.mrf.mxu1 }
  0xa9   : > { %v344_v25 = vadd.f32 %v343_v22, %v303_v17  ;;  %v362_v26 = vadd.f32 %v361_v23, %v303_v17 }
  0xab   : > { %v369_v29 = vmax.f32 %v344_v25, 0.0  ;;  %v370_v30 = vmax.f32 %v362_v26, 0.0 }
  0xad   : > { %v373_v33 = vpack.c.bf16 %v369_v29, %v369_v29  ;;  %v374_v34 = vpack.c.bf16 %v370_v30, %v370_v30 }
  0xaf   : > { %v412_v38 = vsel %vm324_vm0, %v373_v33, 0  ;;  %v415_v39 = vsel %vm324_vm0, %v374_v34, 0 }
  0xb0   : > { %v345_v42 = vpop.f32.mrf.mxu0  ;;  %v363_v43 = vpop.f32.mrf.mxu1  ;;  %423 = vmatpush.bf16.msra.mxu2 %v412_v38  ;;  %441 = vmatpush.bf16.msra.mxu3 %v415_v39 }
  0xb4   : > { %424 = vmatpush.bf16.msra.mxu2 %v371_v44  ;;  %442 = vmatpush.bf16.msra.mxu3 %v372_v45 }
  0xb7   : > { %626 = vmatmul.msk.bf16.vlgmr.msra.gmra.mxu2 %vm404_vm2, %v637_v46  ;;  %628 = vmatmul.msk.bf16.vlgmr.msra.gmra.mxu3 %vm404_vm2, %v637_v46 }
  0xc7   : > { %627 = vmatmul.msk.bf16.gmra.mxu2 %vm404_vm2, %v403_v49  ;;  %629 = vmatmul.msk.bf16.gmra.mxu3 %vm404_vm2, %v403_v49 }
 0x13a   : > { %v426_v50 = vpop.f32.mrf.mxu2  ;;  %v444_v51 = vpop.f32.mrf.mxu3 }
 0x13b   : > { %v427_v1 = vadd.f32 %v426_v50, %v384_v52  ;;  %v445_v2 = vadd.f32 %v444_v51, %v384_v52 }
 0x13d   : > { %v453_v9 = vmax.f32 %v427_v1, 0.0  ;;  %v454_v10 = vmax.f32 %v445_v2, 0.0 }
 0x142   : > { %v428_v53 = vpop.f32.mrf.mxu2  ;;  %v446_v54 = vpop.f32.mrf.mxu3 }
 0x143   : > { %v429_v61 = vadd.f32 %v428_v53, %v389_v56  ;;  %v447_v62 = vadd.f32 %v446_v54, %v389_v56 }
 0x145   : > { %v455_v5 = vmax.f32 %v429_v61, 0.0  ;;  %v456_v6 = vmax.f32 %v447_v62, 0.0 }
 0x147   : > { %v459_v13 = vpack.c.bf16 %v455_v5, %v453_v9  ;;  %v460_v14 = vpack.c.bf16 %v456_v6, %v454_v10 }
 0x14a   : > { %v431_v57 = vpop.f32.mrf.mxu2  ;;  %v449_v58 = vpop.f32.mrf.mxu3 }
 0x14b   : > { %v432_v59 = vadd.f32 %v431_v57, %v394_v55  ;;  %v450_v60 = vadd.f32 %v449_v58, %v394_v55 }
 0x14d   : > { %v457_v63 = vmax.f32 %v432_v59, 0.0  ;;  %v458_v0 = vmax.f32 %v450_v60, 0.0 }
 0x14f   : > { %v461_v3 = vpack.c.bf16 %v457_v63, %v457_v63  ;;  %v462_v4 = vpack.c.bf16 %v458_v0, %v458_v0 }
 0x151   : > { %v474_v7 = vsel %vm324_vm0, %v461_v3, 0  ;;  %v477_v8 = vsel %vm324_vm0, %v462_v4, 0 }
 0x152   : > { %v433_v11 = vpop.f32.mrf.mxu2  ;;  %v451_v12 = vpop.f32.mrf.mxu3  ;;  %485 = vmatpush.bf16.msrb.mxu0 %v474_v7  ;;  %498 = vmatpush.bf16.msrb.mxu1 %v477_v8 }
 0x156   : > { %486 = vmatpush.bf16.msrb.mxu0 %v459_v13  ;;  %499 = vmatpush.bf16.msrb.mxu1 %v460_v14 }
 0x159   : > { %630 = vmatmul.msk.bf16.vlgmr.msrb.gmra.mxu0 %vm404_vm2, %v463_v15  ;;  %631 = vmatmul.msk.bf16.vlgmr.msrb.gmra.mxu1 %vm404_vm2, %v463_v15 }
 0x1d6   : > { %v488_v17 = vpop.f32.mrf.mxu0  ;;  %v501_v18 = vpop.f32.mrf.mxu1 }
 0x1d7   : > { %v489_v19 = vadd.f32 %v488_v17, %v468_v16  ;;  %v502_v20 = vadd.f32 %v501_v18, %v468_v16 }
 0x1d9   : > { %v632_v21 = vmul.f32 -1.442695, %v489_v19  ;;  %v633_v22 = vmul.f32 -1.442695, %v502_v20 }
 0x1db   : > { %650 = vpow2.f32 %v632_v21 }
 0x1dc   : > { %652 = vpow2.f32 %v633_v22 }
 0x1de   : > { %v503_v23 = vpop.f32.mrf.mxu1  ;;  %v490_v24 = vpop.f32.mrf.mxu0 }
 0x1e1   : > { %v651_v25 = vpop.eup %650 }
 0x1e2   : > { %v653_v26 = vpop.eup %652  ;;  %v511_v27 = vadd.f32 1.0, %v651_v25 }
 0x1e3   : > { %v512_v28 = vadd.f32 1.0, %v653_v26 }
 0x1e4   : > { %654 = vrcp.f32 %v511_v27  ;;  %vm518_vm5 = vweird.f32 %v511_v27  ;;  %v524_v40 = vand.u32 2147483648, %v511_v27  ;;  %v522_v41 = vand.u32 2147483647, %v511_v27 }
 0x1e5   : > { %656 = vrcp.f32 %v512_v28  ;;  %v539_v36 = vand.u32 2147483648, %v512_v28  ;;  %v537_v38 = vand.u32 2147483647, %v512_v28  ;;  %vm533_vm7 = vweird.f32 %v512_v28 }
 0x1e6   : > { %v525_v46 = vor.u32 1.1754944e-38, %v524_v40  ;;  %vm523_vm10 = vcmp.eq.f32.partialorder %v522_v41, 8.507059e+37 }
 0x1e7   : > { %v540_v43 = vor.u32 1.1754944e-38, %v539_v36  ;;  %vm538_vm9 = vcmp.eq.f32.partialorder %v537_v38, 8.507059e+37 }
 0x1ea   : > { %v655_v29 = vpop.eup %654 }
 0x1eb   : > { %v657_v30 = vpop.eup %656  ;;  %v514_v31 = vmul.f32 %v655_v29, %v511_v27  ;;  %vm519_vm3 = vweird.f32 %v655_v29 }
 0x1ec   : > { %v529_v32 = vmul.f32 %v657_v30, %v512_v28  ;;  %vm534_vm4 = vweird.f32 %v657_v30  ;;  %vm520_vm6 = vmor %vm518_vm5, %vm519_vm3 }
 0x1ed   : > { %v515_v33 = vsub.f32 1.0, %v514_v31  ;;  %vm535_vm8 = vmor %vm533_vm7, %vm534_vm4 }
 0x1ee   : > { %v530_v34 = vsub.f32 1.0, %v529_v32 }
 0x1ef   : > { %v516_v35 = vmul.f32 %v655_v29, %v515_v33 }
 0x1f0   : > { %v531_v37 = vmul.f32 %v657_v30, %v530_v34 }
 0x1f1   : > { %v517_v39 = vadd.f32 %v655_v29, %v516_v35 }
 0x1f2   : > { %v532_v42 = vadd.f32 %v657_v30, %v531_v37 }
 0x1f3   : > { %v521_v44 = vsel %vm520_vm6, %v655_v29, %v517_v39 }
 0x1f4   : > { %v536_v45 = vsel %vm535_vm8, %v657_v30, %v532_v42  ;;  %v526_v49 = vsel %vm523_vm10, %v525_v46, %v521_v44 }
 0x1f5   : > { %v541_v47 = vsel %vm538_vm9, %v540_v43, %v536_v45 }
 0x1f6   : > { %v545_v48 = vrot.slane %v541_v47, 6 }
 0x1f8   : > { %v546_v50 = vsel %vm324_vm0, %v526_v49, %v545_v48 }
 0x1f9   : > { %548 = vst [vmem:[%s280_s14] sm:$0xf] %v546_v50 }
 0x1fa PF: > { %s17_s24 = sadd.s32 1, %s664_s24  }
 0x1fb   : > { %p14_p4 = scmp.ge.s32.totalorder %s17_s24, 4  }
 0x1fd   :  { %16 = sbr.rel (!%p14_p4) target bundleno = 1 (0x1), region = 78 }

</bundles_post_ra>
